<compile_context>
chip_gen: v6e
topology: v6e:2x2x1
jax: 0.10.0
libtpu: 0.0.40
codegen_flags: <defaults>
</compile_context>

<pallas_src>
import functools

import jax
import jax.numpy as jnp
from jax.experimental import pallas as pl
from jax.experimental.pallas import tpu as pltpu

BN_EPS = 1e-5      # torch.nn.BatchNorm1d default eps
NORM_EPS = 1e-12   # torch.nn.functional.normalize default eps
LANE = 128
SUBLANE = 8


def _round_up(x, m):
    return (x + m - 1) // m * m


def fused_mlp_kernel(x_ref, w_ref, o_ref, *, n_valid, normalize):
    """Grid axis = layer index.  The activation lives in the resident output
    block (constant out block index), so it never round-trips HBM between
    layers and is written back exactly once after the last layer."""
    l = pl.program_id(0)

    # Layer 0: seed the resident activation with the (padded) input features.
    @pl.when(l == 0)
    def _():
        o_ref[...] = x_ref[...]

    a = o_ref[...]                                     # (Np, P) f32  == x_last
    w = w_ref[...]                                     # (P, P)  bf16

    # Linear.  Bias is omitted on purpose: BatchNorm's batch-mean subtraction
    # cancels a per-feature bias exactly, so it is dead work + dead DMA.
    y = jnp.dot(a.astype(jnp.bfloat16), w, preferred_element_type=jnp.float32)

    n_pad = y.shape[0]
    if n_pad != n_valid:
        # Zero padded rows so they do not pollute the batch statistics.
        row_ids = jax.lax.broadcasted_iota(jnp.int32, (n_pad, 1), 0)
        y = jnp.where(row_ids < n_valid, y, 0.0)

    # BatchNorm1d (training mode, biased variance), one pass via sum / sumsq.
    inv_n = 1.0 / float(n_valid)
    s1 = jnp.sum(y, axis=0, keepdims=True)
    s2 = jnp.sum(y * y, axis=0, keepdims=True)
    mean = s1 * inv_n
    var = jnp.maximum(s2 * inv_n - mean * mean, 0.0)
    y = (y - mean) * jax.lax.rsqrt(var + BN_EPS)       # rsqrt -> EUP slot

    # ReLU (dropout p=0 is Identity).
    y = jnp.maximum(y, 0.0)

    # Residual add, skipped for layer 0 (x_last is None in the PyTorch module).
    y = jnp.where(l > 0, y + a, y)

    if normalize:
        # F.normalize(y, p=2, dim=-1) == y * rsqrt(max(sum(y^2), eps^2)):
        # one EUP rsqrt per row instead of sqrt + reciprocal.
        ss = jnp.sum(y * y, axis=-1, keepdims=True)
        y = y * jax.lax.rsqrt(jnp.maximum(ss, NORM_EPS * NORM_EPS))

    o_ref[...] = y


def fused_mlp_forward(x, w_stacked, *, n_valid, normalize):
    """x: (Np, P) f32 padded input; w_stacked: (L, P, P) bf16 padded weights."""
    num_layers, p, _ = w_stacked.shape
    n_pad = x.shape[0]

    kernel = functools.partial(fused_mlp_kernel, n_valid=n_valid,
                               normalize=normalize)
    cost = pl.CostEstimate(
        flops=2 * n_pad * p * p * num_layers,
        transcendentals=num_layers * (p + n_pad),
        bytes_accessed=x.size * 4 + w_stacked.size * 2 + n_pad * p * 4,
    )
    # input block + resident output activation (counted double-buffered to be
    # conservative) + double-buffered weight stream + headroom.
    act_bytes = n_pad * p * 4
    vmem_needed = 4 * act_bytes + 4 * p * p * 2 + (1 << 20)
    vmem_limit = min(max(vmem_needed, 16 * 1024 * 1024), 48 * 1024 * 1024)

    return pl.pallas_call(
        kernel,
        out_shape=jax.ShapeDtypeStruct((n_pad, p), jnp.float32),
        grid_spec=pltpu.PrefetchScalarGridSpec(
            num_scalar_prefetch=0,
            grid=(num_layers,),
            in_specs=[
                # Block index never changes -> input DMA'd once (layer-0 seed).
                pl.BlockSpec((n_pad, p), lambda l: (0, 0)),
                # One (P, P) weight slab per layer -> double-buffered stream,
                # overlapped with the previous layer's compute.
                pl.BlockSpec((None, p, p), lambda l: (l, 0, 0)),
            ],
            # Constant out block index -> activation resident in VMEM across
            # the whole grid, single HBM writeback after the last layer.
            out_specs=pl.BlockSpec((n_pad, p), lambda l: (0, 0)),
        ),
        compiler_params=pltpu.CompilerParams(
            dimension_semantics=("arbitrary",),   # sequential layer dependency
            vmem_limit_bytes=vmem_limit,
        ),
        cost_estimate=cost,
    )(x, w_stacked)


class MLPsPallas:
    """JAX/Pallas port of AML.nn.MLPs (forward pass, training-mode BN, dropout=0)."""

    def __init__(self, in_channels, hidden_channels, num_layers, dropout, dataset,
                 key=jax.random.PRNGKey(0)):
        assert dropout == 0.0, "dropout != 0 not supported in this synthetic kernel"
        # TODO(synk): dropout > 0 would need pltpu.prng_seed/prng_random_bits in-kernel.
        self.dataset = dataset
        self.in_channels = in_channels
        self.hidden_channels = hidden_channels
        self.num_layers = num_layers

        self.weights = []   # (Din, H) f32, pre-transposed Linear weights
        self.biases = []    # (1, H)   f32 (reference only; BN batch stats cancel them)
        dims = [in_channels] + [hidden_channels] * num_layers
        for li in range(num_layers):
            key, kw, kb = jax.random.split(key, 3)
            din, dout = dims[li], dims[li + 1]
            # Deterministic synthetic init (stand-in for switch_init).
            w = jax.random.normal(kw, (din, dout), jnp.float32) / jnp.sqrt(din)
            b = jax.random.normal(kb, (1, dout), jnp.float32) * 0.01
            self.weights.append(w)
            self.biases.append(b)

        # Common lane-dense padded feature width for all layers.
        self.p = max(_round_up(in_channels, LANE), _round_up(hidden_channels, LANE))
        padded = []
        for w in self.weights:
            din, dout = w.shape
            padded.append(jnp.pad(w, ((0, self.p - din), (0, self.p - dout))))
        # (L, P, P) bf16 weight stack streamed layer-by-layer by the kernel.
        self.w_stacked = jnp.stack(padded).astype(jnp.bfloat16)

    def __call__(self, feat):
        normalize = self.dataset != 'ogbl-ddi'
        x = feat.astype(jnp.float32)
        n, din = x.shape
        n_pad = _round_up(n, SUBLANE)
        x = jnp.pad(x, ((0, n_pad - n), (0, self.p - din)))
        out = fused_mlp_forward(x, self.w_stacked, n_valid=n, normalize=normalize)
        return out[:n, :self.hidden_channels]


def reference_forward(model: MLPsPallas, feat):
    """Pure-JAX f32 reference (mirrors the PyTorch module, including the bias)."""
    normalize = model.dataset != 'ogbl-ddi'
    x = feat.astype(jnp.float32)
    x_last = None
    for w, b in zip(model.weights, model.biases):
        y = x @ w + b
        mean = jnp.mean(y, axis=0, keepdims=True)
        var = jnp.mean((y - mean) ** 2, axis=0, keepdims=True)
        y = (y - mean) * jax.lax.rsqrt(var + BN_EPS)
        y = jnp.maximum(y, 0.0)
        if x_last is not None:
            y = y + x_last
        if normalize:
            nrm = jnp.sqrt(jnp.sum(y * y, axis=-1, keepdims=True))
            y = y / jnp.maximum(nrm, NORM_EPS)
        x = y
        x_last = x
    return x


if __name__ == "__main__":
    key = jax.random.PRNGKey(0)
    k_in, k_param = jax.random.split(key)

    N, in_channels, hidden_channels, num_layers = 16, 8, 32, 3
    feat = jax.random.normal(k_in, (N, in_channels), jnp.float32)

    model = MLPsPallas(in_channels, hidden_channels, num_layers,
                       dropout=0.0, dataset='ogbl-collab', key=k_param)

    out = jax.block_until_ready(model(feat))
    ref = reference_forward(model, feat)

    assert out.shape == (N, hidden_channels)
    # bf16 MXU operands (f32 accumulation) -> loosened tolerance vs f32 reference.
    err = jnp.max(jnp.abs(out - ref))
    assert jnp.allclose(out, ref, atol=5e-2, rtol=5e-2), f"mismatch, max|diff|={err}"

    print("KERNEL_OK")
</pallas_src>

<mosaic_0001>
module attributes {stable_mosaic.version = 11 : i64} {
  func.func @fused_mlp_kernel(%arg0: i32, %arg1: memref<16x128xf32, #tpu.memory_space<vmem>>, %arg2: memref<1x128x128xbf16, #tpu.memory_space<vmem>>, %arg3: memref<16x128xf32, #tpu.memory_space<vmem>>) attributes {dimension_semantics = [#tpu.dimension_semantics<arbitrary>], iteration_bounds = array<i64: 3>, scalar_prefetch = 0 : i64, scratch_operands = 0 : i64, tpu.core_type = #tpu.core_type<tc>, window_params = [{pipeline_mode = #tpu.pipeline_mode<synchronous>, transform_indices = @transform_0, window_bounds = array<i64: 16, 128>}, {transform_indices = @transform_1, window_bounds = array<i64: 1, 128, 128>}, {pipeline_mode = #tpu.pipeline_mode<synchronous>, transform_indices = @transform_2, window_bounds = array<i64: 16, 128>}]} {
    %c0_i32 = arith.constant 0 : i32
    %0 = arith.cmpi eq, %arg0, %c0_i32 : i32
    %1 = arith.extui %0 : i1 to i32
    %c0_i32_0 = arith.constant 0 : i32
    %2 = arith.cmpi ne, %1, %c0_i32_0 : i32
    scf.if %2 {
      %c0_17 = arith.constant 0 : index
      %c0_18 = arith.constant 0 : index
      %42 = vector.load %arg1[%c0_17, %c0_18] : memref<16x128xf32, #tpu.memory_space<vmem>>, vector<16x128xf32>
      %c0_19 = arith.constant 0 : index
      %c0_20 = arith.constant 0 : index
      %43 = vector.load %arg3[%c0_19, %c0_20] : memref<16x128xf32, #tpu.memory_space<vmem>>, vector<16x128xf32>
      tpu.vector_store %arg3[%c0_19, %c0_20], %42 {strides = array<i32>} : memref<16x128xf32, #tpu.memory_space<vmem>>, vector<16x128xf32>,
    } else {
    }
    %c0 = arith.constant 0 : index
    %c0_1 = arith.constant 0 : index
    %3 = vector.load %arg3[%c0, %c0_1] : memref<16x128xf32, #tpu.memory_space<vmem>>, vector<16x128xf32>
    %c0_2 = arith.constant 0 : index
    %c0_3 = arith.constant 0 : index
    %c0_4 = arith.constant 0 : index
    %4 = vector.load %arg2[%c0_2, %c0_3, %c0_4] : memref<1x128x128xbf16, #tpu.memory_space<vmem>>, vector<1x128x128xbf16>
    %5 = vector.shape_cast %4 : vector<1x128x128xbf16> to vector<128x128xbf16>
    %6 = arith.truncf %3 : vector<16x128xf32> to vector<16x128xbf16>
    %cst = arith.constant dense<0.000000e+00> : vector<16x128xf32>
    %7 = tpu.matmul %6, %5, %cst {dimension_numbers = #tpu.dot_dimension_numbers<[1], [0], [0], [1], [0, 0, 1, 1], [], []>} : vector<16x128xbf16>, vector<128x128xbf16>, vector<16x128xf32> -> vector<16x128xf32>
    %cst_5 = arith.constant dense<0.000000e+00> : vector<128xf32>
    %8 = vector.multi_reduction <add>, %7, %cst_5 [0] : vector<16x128xf32> to vector<128xf32>
    %9 = vector.shape_cast %8 : vector<128xf32> to vector<1x128xf32>
    %10 = arith.mulf %7, %7 : vector<16x128xf32>
    %cst_6 = arith.constant dense<0.000000e+00> : vector<128xf32>
    %11 = vector.multi_reduction <add>, %10, %cst_6 [0] : vector<16x128xf32> to vector<128xf32>
    %12 = vector.shape_cast %11 : vector<128xf32> to vector<1x128xf32>
    %cst_7 = arith.constant 6.250000e-02 : f32
    %13 = vector.broadcast %cst_7 : f32 to vector<1x128xf32>
    %14 = arith.mulf %9, %13 : vector<1x128xf32>
    %cst_8 = arith.constant 6.250000e-02 : f32
    %15 = vector.broadcast %cst_8 : f32 to vector<1x128xf32>
    %16 = arith.mulf %12, %15 : vector<1x128xf32>
    %17 = arith.mulf %14, %14 : vector<1x128xf32>
    %18 = arith.subf %16, %17 : vector<1x128xf32>
    %cst_9 = arith.constant 0.000000e+00 : f32
    %19 = vector.broadcast %cst_9 : f32 to vector<1x128xf32>
    %20 = arith.maximumf %18, %19 : vector<1x128xf32>
    %21 = vector.broadcast %14 : vector<1x128xf32> to vector<16x128xf32>
    %22 = arith.subf %7, %21 : vector<16x128xf32>
    %cst_10 = arith.constant 9.99999974E-6 : f32
    %23 = vector.broadcast %cst_10 : f32 to vector<1x128xf32>
    %24 = arith.addf %20, %23 : vector<1x128xf32>
    %25 = math.rsqrt %24 : vector<1x128xf32>
    %26 = vector.broadcast %25 : vector<1x128xf32> to vector<16x128xf32>
    %27 = arith.mulf %22, %26 : vector<16x128xf32>
    %cst_11 = arith.constant 0.000000e+00 : f32
    %28 = vector.broadcast %cst_11 : f32 to vector<16x128xf32>
    %29 = arith.maximumf %27, %28 : vector<16x128xf32>
    %c0_i32_12 = arith.constant 0 : i32
    %30 = arith.cmpi sgt, %arg0, %c0_i32_12 : i32
    %31 = arith.addf %29, %3 : vector<16x128xf32>
    %32 = arith.select %30, %31, %29 : vector<16x128xf32>
    %33 = arith.mulf %32, %32 : vector<16x128xf32>
    %cst_13 = arith.constant dense<0.000000e+00> : vector<16xf32>
    %34 = vector.multi_reduction <add>, %33, %cst_13 [1] : vector<16x128xf32> to vector<16xf32>
    %35 = vector.shape_cast %34 : vector<16xf32> to vector<16x1xf32>
    %cst_14 = arith.constant 1.000000e-24 : f32
    %36 = vector.broadcast %cst_14 : f32 to vector<16x1xf32>
    %37 = arith.maximumf %35, %36 : vector<16x1xf32>
    %38 = math.rsqrt %37 : vector<16x1xf32>
    %39 = vector.broadcast %38 : vector<16x1xf32> to vector<16x128xf32>
    %40 = arith.mulf %32, %39 : vector<16x128xf32>
    %c0_15 = arith.constant 0 : index
    %c0_16 = arith.constant 0 : index
    %41 = vector.load %arg3[%c0_15, %c0_16] : memref<16x128xf32, #tpu.memory_space<vmem>>, vector<16x128xf32>
    tpu.vector_store %arg3[%c0_15, %c0_16], %40 {strides = array<i32>} : memref<16x128xf32, #tpu.memory_space<vmem>>, vector<16x128xf32>,
    return
  }
  func.func @transform_0(%arg0: i32) -> (i32, i32) {
    %c0_i32 = arith.constant 0 : i32
    %c0_i32_0 = arith.constant 0 : i32
    %c0_i32_1 = arith.constant 0 : i32
    return %c0_i32, %c0_i32_0 : i32, i32
  }
  func.func @transform_1(%arg0: i32) -> (i32, i32, i32) {
    %c0_i32 = arith.constant 0 : i32
    %c0_i32_0 = arith.constant 0 : i32
    %c0_i32_1 = arith.constant 0 : i32
    return %arg0, %c0_i32, %c0_i32_0 : i32, i32, i32
  }
  func.func @transform_2(%arg0: i32) -> (i32, i32) {
    %c0_i32 = arith.constant 0 : i32
    %c0_i32_0 = arith.constant 0 : i32
    %c0_i32_1 = arith.constant 0 : i32
    return %c0_i32, %c0_i32_0 : i32, i32
  }
}

</mosaic_0001>

<bundles_post_ra>
// kernel: tpu_custom_call.1
= control target key start
LH: loop header
LB: loop body
LE: loop exit
PB: predicated region body
PF: predicated region fallthrough
CT: control target
= control target key end

     0   :  { %7 = vsyncpa [#allocation3], 0  ;;  %s831_s0 = inlined_call_operand.hbm [shape: f32[16,128], index: 0, kind: input, shape index: {}]   ;;  %s832_s1 = inlined_call_operand.hbm [shape: bf16[3,128,128], index: 1, kind: input, shape index: {}]   ;;  %s833_s2 = inlined_call_operand.hbm [shape: f32[16,128], index: 2, kind: output, shape index: {}]  }
   0x1   :  { %8 = vsyncpa [#allocation6], 0 }
   0x2   :  { %10 = vsyncpa [#allocation6 + $0x1], 0 }
   0x3   :  { %11 = vsyncpa [#allocation4], 0  ;;  %s684_s9 = smov 0   ;;  %s686_s10 = smov 0  }
   0x4   :  { %s688_s11 = smov 0   ;;  %s690_s12 = smov 0  }
   0x5 LB: > { %s703_s13 = sadd.s32 4294967295, %s656_s12   ;;  %p58_p0 = scmp.ne.s32.totalorder %s648_s10, %s644_s9  ;;  %s656_s12 = sphi %s690_s12, %s849_s12   ;;  %s652_s11 = sphi %s688_s11, %s848_s11   ;;  %s648_s10 = sphi %s686_s10, %s847_s10   ;;  %s644_s9 = sphi %s684_s9, %s846_s9  }
   0x6   : > { %p834_p1 = scmp.eq.s32.totalorder %s703_s13, 0  ;;  %p405_p2 = scmp.ge.s32.totalorder %s656_s12, 1 }
   0x7   : > { %p90_p3 = scmp.lt.s32.totalorder %s656_s12, 4  ;;  %s658_s16 = smov [#allocation2]  }
   0x8   : > { %p712_p5 = por %p834_p1, %p58_p0  ;;  %s102_s17 = sshll.u32 %s658_s16, 4  ;;  %s103_s17 = int_to_ptr.vmem [resolvable:$true] %s102_s17 }
   0x9   : > { %p716_p6 = pnand %p405_p2, %p90_p3  ;;  %s729_s19 = sadd.s32 1, %s656_s12  }
   0xa   : > { %s837_s14 = scalar_select %p712_p5, 1, 0 }
   0xb   : > { %s838_s15 = scalar_select %p716_p6, 1, 0 }
   0xc   : > { %p467_p7 = pneg %p716_p6  ;;  %s45_s20 = sadd.s32 1, %s652_s11 }
   0xd   : > { %s42_s21 = ssub.s32 %s656_s12, %s729_s19  ;;  %s547_s22 = scalar_lea.vmem %s103_s17, 256 }
   0xe   : > { %p724_p8 = pnand %p467_p7, %p834_p1  ;;  %p548_p10 = scmp.ne.s32.totalorder %s103_s17, %s547_s22 }
   0xf   : > { %p555_p13 = scmp.lt.s32.totalorder %s103_s17, %s103_s17  ;;  %p556_p0 = scmp.lt.s32.totalorder %s547_s22, %s547_s22 }
  0x10   : > { %p538_p9 = pneg %p724_p8 }
  0x11   : > { %p557_p2 = por %p556_p0, %p555_p13 }
  0x12   : > { %p550_p11 = pnand %p548_p10, %p538_p9 }
  0x14   : > { %p551_p12 = pneg %p550_p11 }
  0x16   : > { %p558_p3 = pnand %p557_p2, %p551_p12 }
  0x18   : > { %561 = shalt.err (!%p558_p3)
}
  0x19   : > { %s659_s23 = smov 128   ;;  %s660_s24 = smov 8  }
  0x1a   : > { %470 = dma.hbm_to_vmem [thread:$0]  (!%p724_p8), %s831_s0, 256, %s103_s17, [#allocation3], %s659_s23, %s659_s23, %s660_s24  }
  0x1b   : > { %p43_p7 = scmp.eq.s32.totalorder %s42_s21, 0  ;;  %p52_p9 = scmp.ne.s32.totalorder %s652_s11, %s648_s10 }
  0x1c   : > { %p53_p10 = scmp.eq.s32.totalorder %s656_s12, 0  ;;  %p476_p11 = scmp.lt.s32.totalorder %s656_s12, 3 }
  0x1d   : > { %s746_s27 = scalar_select %p43_p7, %s652_s11, %s45_s20  }
  0x1e   : > { %p54_p12 = por %p53_p10, %p52_p9  ;;  %s116_s28 = sand.u32 1, %s652_s11  }
  0x1f   : > { %s408_s29 = sshll.u32 %s116_s28, 6  ;;  %s427_s30 = sshll.u32 %s656_s12, 10 }
  0x20   : > { %s753_s5 = scalar_lea.hbm %s832_s1, %s427_s30  ;;  %s120_s6 = scalar_lea.vmem [#allocation5], %s408_s29 }
  0x21   : > { %s127_s7 = sshll.u32 %s120_s6, 4  ;;  %p757_p8 = pnand %p476_p11, %p54_p12  ;;  %s755_s7 = int_to_ptr.vmem [resolvable:$true] %s127_s7 }
  0x22   : > { %s761_s9 = scalar_lea.sflag [#allocation6], %s116_s28  ;;  %s562_s12 = scalar_lea.hbm %s753_s5, 1024 }
  0x23   : > { %p563_p13 = scmp.ne.s32.totalorder %s753_s5, %s562_s12  ;;  %p564_p0 = pneg %p757_p8 }
  0x24   : > { %s567_s18 = scalar_lea.hbm %s832_s1, 3072  ;;  %p568_p7 = scmp.lt.s32.totalorder %s753_s5, %s832_s1 }
  0x25   : > { %p565_p2 = pnand %p564_p0, %p563_p13  ;;  %p569_p9 = scmp.lt.s32.totalorder %s567_s18, %s562_s12 }
  0x27   : > { %p566_p3 = pneg %p565_p2  ;;  %p570_p10 = por %p569_p9, %p568_p7 }
  0x29   : > { %p571_p11 = pnand %p570_p10, %p566_p3 }
  0x2b   : > { %574 = shalt.err (!%p571_p11)
}
  0x2c   : > { %s575_s22 = scalar_lea.vmem %s755_s7, 1024  ;;  %s661_s23 = smov [#allocation5]  }
  0x2d   : > { %p576_p12 = scmp.ne.s32.totalorder %s755_s7, %s575_s22  ;;  %s580_s24 = sshll.u32 %s661_s23, 4  ;;  %s581_s24 = int_to_ptr.vmem [resolvable:$false] %s580_s24 }
  0x2e   : > { %s582_s25 = scalar_lea.vmem %s581_s24, 2048  ;;  %p583_p2 = scmp.lt.s32.totalorder %s755_s7, %s581_s24 }
  0x2f   : > { %p578_p4 = pnand %p576_p12, %p564_p0  ;;  %p584_p1 = scmp.lt.s32.totalorder %s582_s25, %s575_s22 }
  0x31   : > { %p579_p13 = pneg %p578_p4  ;;  %p585_p5 = por %p584_p1, %p583_p2 }
  0x33   : > { %p586_p6 = pnand %p585_p5, %p579_p13 }
  0x35   : > { %589 = shalt.err (!%p586_p6)
}
  0x36   : > { %s662_s26 = smov 64   ;;  %s663_s28 = smov 4  }
  0x37   : > { %474 = dma.hbm_to_vmem [thread:$0]  (!%p757_p8), %s753_s5, 1024, %s755_s7, %s761_s9, %s662_s26, %s662_s26, %s663_s28  }
  0x38   : > { %p841_p0 = scmp.ne.s32.totalorder %s838_s15, 0 }
  0x39   : > { %p842_p4 = scmp.eq.s32.totalorder (!%p841_p0), %s703_s13, 0 }
  0x3a   : > { %139 = sbr.rel (%p841_p0) target bundleno = 520 (0x208), region = 28 }
  0x3f   : > { %631 = dma.done.wait (%p842_p4), [#allocation3], 256   ;;  %p843_p3 = pmov %p842_p4 }
  0x40   : > { %s145_s29 = sand.u32 1, %s648_s10   ;;  %p844_p1 = scmp.ne.s32.totalorder %s837_s14, 0 }
  0x41   : > { %633 = vsyncadd (%p843_p3), [#allocation3], 4294967040  ;;  %s413_s30 = sshll.u32 %s145_s29, 6  ;;  %s146_s3 = scalar_lea.sflag [#allocation6], %s145_s29 }
  0x42   : > { %s789_s4 = scalar_lea.vmem [#allocation5], %s413_s30 }
  0x43   : > { %635 = dma.done.wait (%p844_p1), %s146_s3, 1024  }
  0x44   : > { %637 = vsyncadd (%p844_p1), %s146_s3, 4294966272  ;;  %p845_p5 = scmp.ne.s32.totalorder %s703_s13, 0 }
  0x46   : > { %169 = sbr.rel (%p845_p5) target bundleno = 77 (0x4d), region = 40 }
  0x4b   : > { %v170_v0 = vld [vmem:[#allocation2] sm:$0xff]  ;;  %v171_v1 = vld [vmem:[#allocation2 + $0x8] sm:$0xff] }
  0x4c   : > { %172 = vst [vmem:[#allocation7] sm:$0xff] %v170_v0  ;;  %173 = vst [vmem:[#allocation7 + $0x8] sm:$0xff] %v171_v1 }
  0x4d PF: > { %v522_v2 = vld [vmem:[%s789_s4 + $0x38] sm:$0xff]   ;;  %v664_v3 = vmov 0.0   ;;  %v523_v4 = vld [vmem:[%s789_s4 + $0x30] sm:$0xff]   ;;  %vm665_vm0 = vmmov 0   ;;  %v524_v5 = vld [vmem:[%s789_s4 + $0x28] sm:$0xff]   ;;  %p311_p6 = scmp.gt.s32.totalorder %s703_s13, 0 }
  0x4e   : > { %437 = vmatprep.subr.bf16.mxu0 %v664_v3  ;;  %453 = vmatprep.mubr.msk.bf16.mxu0 %vm665_vm0, %v664_v3  ;;  %v525_v6 = vld [vmem:[%s789_s4 + $0x20] sm:$0xff]   ;;  %v526_v7 = vld [vmem:[%s789_s4 + $0x18] sm:$0xff]   ;;  %v527_v8 = vld [vmem:[%s789_s4 + $0x10] sm:$0xff]   ;;  %s666_s15 = smov [#allocation7]   ;;  %p478_p8 = scmp.eq.s32.totalorder %s703_s13, 2 }
  0x4f   : > { %438 = vmatpush3.bf16.msra.mxu0 %v522_v2  ;;  %v528_v9 = vld [vmem:[%s789_s4 + $0x8] sm:$0xff]   ;;  %v529_v10 = vld [vmem:[%s789_s4] sm:$0xff]   ;;  %s314_s14 = scalar_select %p311_p6, 1, 0 }
  0x50   : > { %439 = vmatprep.subr.bf16.mxu0 %v664_v3  ;;  %s339_s5 = sshll.u32 %s666_s15, 4  ;;  %s340_s5 = int_to_ptr.vmem [resolvable:$true] %s339_s5 }
  0x51   : > { %v315_v45 = vstv %s314_s14  ;;  %s590_s6 = scalar_lea.vmem %s340_s5, 256  ;;  %p597_p11 = scmp.lt.s32.totalorder %s340_s5, %s340_s5 }
  0x52   : > { %vm316_vm1 = vcmp.eq.s32.totalorder %v315_v45, 1  ;;  %p591_p7 = scmp.ne.s32.totalorder %s340_s5, %s590_s6  ;;  %p598_p12 = scmp.lt.s32.totalorder %s590_s6, %s590_s6 }
  0x53   : > { %440 = vmatpush3.bf16.msra.mxu0 %v523_v4  ;;  %v174_v11 = vld [vmem:[#allocation7] sm:$0xff]  ;;  %v175_v12 = vld [vmem:[#allocation7 + $0x8] sm:$0xff] }
  0x54   : > { %441 = vmatprep.subr.bf16.mxu0 %v664_v3  ;;  %v192_v13 = vpack.c.bf16 %v175_v12, %v174_v11  ;;  %p592_p9 = pnand %p591_p7, %p478_p8  ;;  %p599_p13 = por %p598_p12, %p597_p11 }
  0x56   : > { %p593_p10 = pneg %p592_p9 }
  0x57   : > { %442 = vmatpush3.bf16.msra.mxu0 %v524_v5 }
  0x58   : > { %443 = vmatprep.subr.bf16.mxu0 %v664_v3  ;;  %p600_p2 = pnand %p599_p13, %p593_p10 }
  0x5b   : > { %444 = vmatpush3.bf16.msra.mxu0 %v525_v6 }
  0x5c   : > { %445 = vmatprep.subr.bf16.mxu0 %v664_v3 }
  0x5f   : > { %446 = vmatpush3.bf16.msra.mxu0 %v526_v7 }
  0x60   : > { %447 = vmatprep.subr.bf16.mxu0 %v664_v3 }
  0x63   : > { %448 = vmatpush3.bf16.msra.mxu0 %v527_v8 }
  0x64   : > { %449 = vmatprep.subr.bf16.mxu0 %v664_v3 }
  0x67   : > { %450 = vmatpush3.bf16.msra.mxu0 %v528_v9 }
  0x68   : > { %451 = vmatprep.subr.bf16.mxu0 %v664_v3 }
  0x6b   : > { %452 = vmatpush3.bf16.msra.mxu0 %v529_v10 }
  0x6e   : > { %454 = vmatmul.mubr.bf16.vlgmr.msra.gmra.mxu0 %v192_v13 }
 0x12e   : > { %v275_v14 = vpop.f32.mrf.mxu0 }
 0x12f   : > { %v289_v17 = vmul.f32 %v275_v14, %v275_v14 }
 0x130   : > { %v455_v15 = vpop.f32.mrf.mxu0 }
 0x132   : > { %v278_v16 = vpop.f32.mrf.mxu0 }
 0x133   : > { %v282_v18 = vadd.f32 %v278_v16, %v275_v14  ;;  %v290_v19 = vmul.f32 %v278_v16, %v278_v16 }
 0x134   : > { %v456_v20 = vpop.f32.mrf.mxu0 }
 0x135   : > { %v283_v21 = vrot.slane %v282_v18, 4  ;;  %v291_v22 = vadd.f32 %v290_v19, %v289_v17 }
 0x137   : > { %v284_v23 = vadd.f32 %v283_v21, %v282_v18  ;;  %v292_v24 = vrot.slane %v291_v22, 4 }
 0x139   : > { %v285_v25 = vrot.slane %v284_v23, 2  ;;  %v293_v26 = vadd.f32 %v292_v24, %v291_v22 }
 0x13b   : > { %v286_v27 = vadd.f32 %v285_v25, %v284_v23  ;;  %v294_v28 = vrot.slane %v293_v26, 2 }
 0x13d   : > { %v287_v29 = vrot.slane %v286_v27, 1  ;;  %v295_v30 = vadd.f32 %v294_v28, %v293_v26 }
 0x13f   : > { %v288_v31 = vadd.f32 %v287_v29, %v286_v27  ;;  %v296_v32 = vrot.slane %v295_v30, 1 }
 0x141   : > { %v297_v33 = vadd.f32 %v296_v32, %v295_v30  ;;  %v298_v34 = vmul.f32 0.0625, %v288_v31 }
 0x143   : > { %v299_v35 = vmul.f32 0.0625, %v297_v33  ;;  %v300_v36 = vmul.f32 %v298_v34, %v298_v34  ;;  %v304_v40 = vsub.f32 %v278_v16, %v298_v34  ;;  %v303_v41 = vsub.f32 %v275_v14, %v298_v34 }
 0x145   : > { %v301_v37 = vsub.f32 %v299_v35, %v300_v36 }
 0x147   : > { %v302_v38 = vmax.f32 %v301_v37, 0.0 }
 0x149   : > { %v305_v39 = vadd.f32 1e-05, %v302_v38 }
 0x14b   : > { %530 = vrsqrt.f32 %v305_v39 }
 0x158   : > { %v531_v42 = vpop.eup %530 }
 0x159   : > { %v308_v43 = vmul.f32 %v531_v42, %v304_v40  ;;  %v307_v44 = vmul.f32 %v531_v42, %v303_v41 }
 0x15b   : > { %v310_v46 = vmax.f32 %v308_v43, 0.0  ;;  %v309_v47 = vmax.f32 %v307_v44, 0.0 }
 0x15d   : > { %v312_v48 = vadd.f32 %v309_v47, %v174_v11  ;;  %v313_v49 = vadd.f32 %v310_v46, %v175_v12 }
 0x15f   : > { %v317_v50 = vsel %vm316_vm1, %v312_v48, %v309_v47  ;;  %v318_v52 = vsel %vm316_vm1, %v313_v49, %v310_v46 }
 0x160   : > { %v319_v51 = vmul.f32 %v317_v50, %v317_v50  ;;  %v320_v53 = vmul.f32 %v318_v52, %v318_v52 }
 0x162   : > { %321 = vadd.xlane.f32.xlu0 %v319_v51 }
 0x166   : > { %323 = vadd.xlane.f32.xlu0 %v320_v53 }
 0x1eb   : > { %v322_v54 = vpop.xlane.xlu0 %321 }
 0x1ec   : > { %v325_v55 = vmax.f32 %v322_v54, 1e-24 }
 0x1ee   : > { %532 = vrsqrt.f32 %v325_v55 }
 0x1ef   : > { %v324_v56 = vpop.xlane.xlu0 %323 }
 0x1f0   : > { %v326_v57 = vmax.f32 %v324_v56, 1e-24 }
 0x1f2   : > { %534 = vrsqrt.f32 %v326_v57 }
 0x1fb   : > { %v533_v58 = vpop.eup %532 }
 0x1fc   : > { %v329_v59 = vmul.f32 %v533_v58, %v317_v50 }
 0x1fe   : > { %331 = vst [vmem:[#allocation7] sm:$0xff] %v329_v59 }
 0x1ff   : > { %v535_v60 = vpop.eup %534 }
 0x200   : > { %v330_v61 = vmul.f32 %v535_v60, %v318_v52 }
 0x202   : > { %332 = vst [vmem:[#allocation7 + $0x8] sm:$0xff] %v330_v61 }
 0x203   : > { %603 = shalt.err (!%p600_p2)
}
 0x204   : > { %s667_s7 = smov 128   ;;  %s668_s8 = smov 8  }
 0x205   : > { %464 = dma.vmem_to_hbm [thread:$0]  (%p478_p8), %s340_s5, 256, %s833_s2, [#allocation4], %s667_s7, %s667_s7, %s668_s8  }
 0x206   : > { %639 = dma.done.wait (%p478_p8), [#allocation4], 256  }
 0x207   : > { %641 = vsyncadd (%p478_p8), [#allocation4], 4294967040 }
 0x208 PF: > { %p14_p0 = scmp.ge.s32.totalorder %s729_s19, 5   ;;  %s846_s9 = smov %s648_s10 }
 0x209   : > { %s847_s10 = smov %s652_s11  ;;  %s848_s11 = smov %s746_s27 }
 0x20a   : > { %s849_s12 = smov %s729_s19  ;;  %16 = sbr.rel (!%p14_p0) target bundleno = 5 (0x5), region = 74 }
 0x20f   :  { %355 = vsyncpa [#allocation3], 1 }
 0x210   :  { %357 = vsyncpa [#allocation3 + $0x1], 1 }
 0x211   :  { %358 = vsyncpa [#allocation6], 1 }
 0x212   :  { %360 = vsyncpa [#allocation6 + $0x1], 1 }
 0x213   :  { %361 = vsyncpa [#allocation4], 1 }
 0x214   :  { %363 = vsyncpa [#allocation4 + $0x1], 1 }

</bundles_post_ra>
